<compile_context>
chip_gen: v7x
topology: tpu7x:2x2x1
jax: 0.10.0
libtpu: 0.0.40
codegen_flags: <defaults>
</compile_context>

<pallas_src>
import functools

import jax
import jax.numpy as jnp
from jax.experimental import pallas as pl
from jax.experimental.pallas import tpu as pltpu


_LANE = 128
_XLA_FALLBACK_ELEMS = 64 * 1024          # below this, pallas_call fixed cost dominates
_MAX_IO_TILE_BYTES = 12 * 1024 * 1024    # diminishing returns past ~12 MiB per buffer


def _layernorm1d_kernel(x_ref, w_ref, b_ref, o_ref, *, eps, inv_c):
    # x_ref / o_ref: (Nb, C, TL); w_ref / b_ref: (1, C, 1).
    # Single pass over the tile: S1 = sum_C(x), S2 = sum_C(x*x); no full-tile
    # (x - u) temp is kept live across a second reduction pass.
    x = x_ref[...].astype(jnp.float32)
    s1 = jnp.sum(x, axis=1, keepdims=True)          # (Nb, 1, TL)
    s2 = jnp.sum(x * x, axis=1, keepdims=True)      # (Nb, 1, TL)
    u = s1 * inv_c
    var = jnp.maximum(s2 * inv_c - u * u, 0.0)      # clamp: E[x^2]-E[x]^2 can dip < 0
    inv = jax.lax.rsqrt(var + eps)                  # EUP slot (free vs VALU)
    w = w_ref[...].astype(jnp.float32)              # (1, C, 1): broadcast over N, L
    b = b_ref[...].astype(jnp.float32)
    # Fused normalize + per-channel affine straight into the output store.
    o_ref[...] = ((x - u) * inv * w + b).astype(o_ref.dtype)


def _layernorm1d_xla(x, weight, bias, eps):
    x32 = x.astype(jnp.float32)
    u = jnp.mean(x32, axis=1, keepdims=True)
    s = jnp.mean(jnp.square(x32 - u), axis=1, keepdims=True)
    y = (x32 - u) * jax.lax.rsqrt(s + eps)
    return (weight[None, :, None].astype(jnp.float32) * y
            + bias[None, :, None].astype(jnp.float32)).astype(x.dtype)


def _vmem_capacity_bytes():
    try:
        return int(pltpu.get_tpu_info().vmem_capacity_bytes)
    except Exception:
        return 64 * 1024 * 1024   # conservative default: v7x per-TensorCore VMEM


def _tile_budget_elems(vmem_cap, itemsize):
    """Max elements per I/O tile so live VMEM (buffers + f32 temps) fits comfortably."""
    usable = (vmem_cap * 3) // 4                      # headroom for Mosaic scratch
    # 2x double-buffered input + 2x double-buffered output (itemsize each)
    # + ~2 f32 working copies inside the kernel body.
    bytes_per_elem = 4 * itemsize + 2 * 4
    elems = usable // bytes_per_elem
    elems = min(elems, _MAX_IO_TILE_BYTES // itemsize)
    return max(elems, _LANE * 8)


def _choose_tiles(N, C, L, budget_elems):
    """Pick (Nb, TL): lane-dense L tiles; batch N to amortize per-step overhead."""
    if L <= _LANE:
        tl = L                                        # full (small) L: block == array dim
    else:
        max_tl = max(_LANE, (budget_elems // max(C, 1)) // _LANE * _LANE)
        tl = L if max_tl >= L else max_tl             # full L, or a multiple of 128
    nb = max(1, min(N, budget_elems // max(C * tl, 1)))
    # v7x megacore: expose >= 2 blocks along a "parallel" axis when possible.
    if pl.cdiv(N, nb) * pl.cdiv(L, tl) < 2:
        if N > 1:
            nb = pl.cdiv(N, 2)
        elif L > _LANE:
            tl = max(_LANE, pl.cdiv(pl.cdiv(L, _LANE), 2) * _LANE)
    return nb, tl


def layernorm1d(x, weight, bias, eps: float = 1e-6, *, force_pallas: bool = False):
    """x: [N, C, L]; weight, bias: [C]. Returns [N, C, L] (same dtype as x)."""
    N, C, L = x.shape

    if not force_pallas and N * C * L < _XLA_FALLBACK_ELEMS:
        return _layernorm1d_xla(x, weight, bias, eps)

    itemsize = x.dtype.itemsize
    vmem_cap = _vmem_capacity_bytes()
    budget_elems = _tile_budget_elems(vmem_cap, itemsize)

    if C * min(L, _LANE) > budget_elems:
        # TODO(synk): for very large C, split the channel axis across an extra
        # "arbitrary" grid dimension with VMEM partial-sum scratch finalized under
        # pl.when; fall back to fused XLA for now to avoid VMEM OOM.
        return _layernorm1d_xla(x, weight, bias, eps)

    nb, tl = _choose_tiles(N, C, L, budget_elems)
    grid = (pl.cdiv(N, nb), pl.cdiv(L, tl))           # ragged edges masked by Pallas

    w = weight.reshape(1, C, 1)
    b = bias.reshape(1, C, 1)
    kernel = functools.partial(_layernorm1d_kernel, eps=eps, inv_c=1.0 / C)

    return pl.pallas_call(
        kernel,
        out_shape=jax.ShapeDtypeStruct((N, C, L), x.dtype),
        grid_spec=pltpu.PrefetchScalarGridSpec(
            num_scalar_prefetch=0,
            grid=grid,
            in_specs=[
                pl.BlockSpec((nb, C, tl), lambda n, l: (n, 0, l)),
                pl.BlockSpec((1, C, 1), lambda n, l: (0, 0, 0)),
                pl.BlockSpec((1, C, 1), lambda n, l: (0, 0, 0)),
            ],
            out_specs=pl.BlockSpec((nb, C, tl), lambda n, l: (n, 0, l)),
        ),
        compiler_params=pltpu.CompilerParams(
            dimension_semantics=("parallel", "parallel"),
            vmem_limit_bytes=int((vmem_cap * 3) // 4),
        ),
    )(x, w, b)


def _reference(x, weight, bias, eps=1e-6):
    x32 = x.astype(jnp.float32)
    u = jnp.mean(x32, axis=1, keepdims=True)
    s = jnp.mean((x32 - u) ** 2, axis=1, keepdims=True)
    y = (x32 - u) / jnp.sqrt(s + eps)
    return weight[None, :, None] * y + bias[None, :, None]   # f32 reference


if __name__ == "__main__":
    eps = 1e-6
    key = jax.random.PRNGKey(0)

    # (N, C, L, dtype, force_pallas, atol)
    cases = [
        (2, 39, 16, jnp.float32, False, 1e-5),    # tiny: fused-XLA fallback path
        (2, 39, 16, jnp.float32, True, 1e-5),     # tiny, forced through the kernel
        (7, 39, 300, jnp.float32, False, 1e-5),   # pallas path, ragged N edge block
        (1, 39, 300, jnp.float32, True, 1e-5),    # pallas path, ragged 128-multiple L tile
        (2, 64, 384, jnp.bfloat16, True, 5e-2),   # bf16 I/O, f32 accumulation in-kernel
    ]

    for i, (N, C, L, dtype, force, atol) in enumerate(cases):
        kx, kw, kb = jax.random.split(jax.random.fold_in(key, i), 3)
        x = jax.random.normal(kx, (N, C, L), dtype=jnp.float32).astype(dtype)
        # Non-trivial affine params to verify the per-channel broadcast
        # (the module inits to ones/zeros; random values are a stricter test).
        weight = 1.0 + 0.1 * jax.random.normal(kw, (C,), dtype=jnp.float32)
        bias = 0.1 * jax.random.normal(kb, (C,), dtype=jnp.float32)

        out = jax.block_until_ready(
            layernorm1d(x, weight, bias, eps=eps, force_pallas=force))
        ref = _reference(x, weight, bias, eps=eps)

        assert out.shape == (N, C, L) and out.dtype == jnp.dtype(dtype), f"case {i} shape/dtype"
        err = jnp.max(jnp.abs(out.astype(jnp.float32) - ref))
        assert err < atol, f"case {i}: max abs err {err} >= {atol}"

    print("KERNEL_OK")
</pallas_src>

<mosaic_0001>
module attributes {stable_mosaic.version = 11 : i64} {
  func.func @_layernorm1d_kernel(%arg0: i32, %arg1: i32, %arg2: memref<1x39x16xf32, #tpu.memory_space<vmem>>, %arg3: memref<1x39x1xf32, #tpu.memory_space<vmem>>, %arg4: memref<1x39x1xf32, #tpu.memory_space<vmem>>, %arg5: memref<1x39x16xf32, #tpu.memory_space<vmem>>) attributes {dimension_semantics = [#tpu.dimension_semantics<parallel>, #tpu.dimension_semantics<parallel>], iteration_bounds = array<i64: 2, 1>, scalar_prefetch = 0 : i64, scratch_operands = 0 : i64, tpu.core_type = #tpu.core_type<tc>, window_params = [{transform_indices = @transform_0, window_bounds = array<i64: 1, 39, 16>}, {pipeline_mode = #tpu.pipeline_mode<synchronous>, transform_indices = @transform_1, window_bounds = array<i64: 1, 39, 1>}, {pipeline_mode = #tpu.pipeline_mode<synchronous>, transform_indices = @transform_2, window_bounds = array<i64: 1, 39, 1>}, {transform_indices = @transform_3, window_bounds = array<i64: 1, 39, 16>}]} {
    %c0 = arith.constant 0 : index
    %c0_0 = arith.constant 0 : index
    %c0_1 = arith.constant 0 : index
    %0 = vector.load %arg2[%c0, %c0_0, %c0_1] : memref<1x39x16xf32, #tpu.memory_space<vmem>>, vector<1x39x16xf32>
    %cst = arith.constant dense<0.000000e+00> : vector<1x16xf32>
    %1 = vector.multi_reduction <add>, %0, %cst [1] : vector<1x39x16xf32> to vector<1x16xf32>
    %2 = vector.shape_cast %1 : vector<1x16xf32> to vector<1x1x16xf32>
    %3 = arith.mulf %0, %0 : vector<1x39x16xf32>
    %cst_2 = arith.constant dense<0.000000e+00> : vector<1x16xf32>
    %4 = vector.multi_reduction <add>, %3, %cst_2 [1] : vector<1x39x16xf32> to vector<1x16xf32>
    %5 = vector.shape_cast %4 : vector<1x16xf32> to vector<1x1x16xf32>
    %cst_3 = arith.constant 0.025641026 : f32
    %6 = vector.broadcast %cst_3 : f32 to vector<1x1x16xf32>
    %7 = arith.mulf %2, %6 : vector<1x1x16xf32>
    %cst_4 = arith.constant 0.025641026 : f32
    %8 = vector.broadcast %cst_4 : f32 to vector<1x1x16xf32>
    %9 = arith.mulf %5, %8 : vector<1x1x16xf32>
    %10 = arith.mulf %7, %7 : vector<1x1x16xf32>
    %11 = arith.subf %9, %10 : vector<1x1x16xf32>
    %cst_5 = arith.constant 0.000000e+00 : f32
    %12 = vector.broadcast %cst_5 : f32 to vector<1x1x16xf32>
    %13 = arith.maximumf %11, %12 : vector<1x1x16xf32>
    %cst_6 = arith.constant 9.99999997E-7 : f32
    %14 = vector.broadcast %cst_6 : f32 to vector<1x1x16xf32>
    %15 = arith.addf %13, %14 : vector<1x1x16xf32>
    %16 = math.rsqrt %15 : vector<1x1x16xf32>
    %c0_7 = arith.constant 0 : index
    %c0_8 = arith.constant 0 : index
    %c0_9 = arith.constant 0 : index
    %17 = vector.load %arg3[%c0_7, %c0_8, %c0_9] : memref<1x39x1xf32, #tpu.memory_space<vmem>>, vector<1x39x1xf32>
    %c0_10 = arith.constant 0 : index
    %c0_11 = arith.constant 0 : index
    %c0_12 = arith.constant 0 : index
    %18 = vector.load %arg4[%c0_10, %c0_11, %c0_12] : memref<1x39x1xf32, #tpu.memory_space<vmem>>, vector<1x39x1xf32>
    %19 = vector.broadcast %7 : vector<1x1x16xf32> to vector<1x39x16xf32>
    %20 = arith.subf %0, %19 : vector<1x39x16xf32>
    %21 = vector.broadcast %16 : vector<1x1x16xf32> to vector<1x39x16xf32>
    %22 = arith.mulf %20, %21 : vector<1x39x16xf32>
    %23 = vector.broadcast %17 : vector<1x39x1xf32> to vector<1x39x16xf32>
    %24 = arith.mulf %22, %23 : vector<1x39x16xf32>
    %25 = vector.broadcast %18 : vector<1x39x1xf32> to vector<1x39x16xf32>
    %26 = arith.addf %24, %25 : vector<1x39x16xf32>
    %c0_13 = arith.constant 0 : index
    %c0_14 = arith.constant 0 : index
    %c0_15 = arith.constant 0 : index
    %27 = vector.load %arg5[%c0_13, %c0_14, %c0_15] : memref<1x39x16xf32, #tpu.memory_space<vmem>>, vector<1x39x16xf32>
    tpu.vector_store %arg5[%c0_13, %c0_14, %c0_15], %26 {strides = array<i32>} : memref<1x39x16xf32, #tpu.memory_space<vmem>>, vector<1x39x16xf32>,
    return
  }
  func.func @transform_0(%arg0: i32, %arg1: i32) -> (i32, i32, i32) {
    %c0_i32 = arith.constant 0 : i32
    %c0_i32_0 = arith.constant 0 : i32
    return %arg0, %c0_i32, %arg1 : i32, i32, i32
  }
  func.func @transform_1(%arg0: i32, %arg1: i32) -> (i32, i32, i32) {
    %c0_i32 = arith.constant 0 : i32
    %c0_i32_0 = arith.constant 0 : i32
    %c0_i32_1 = arith.constant 0 : i32
    %c0_i32_2 = arith.constant 0 : i32
    return %c0_i32, %c0_i32_0, %c0_i32_1 : i32, i32, i32
  }
  func.func @transform_2(%arg0: i32, %arg1: i32) -> (i32, i32, i32) {
    %c0_i32 = arith.constant 0 : i32
    %c0_i32_0 = arith.constant 0 : i32
    %c0_i32_1 = arith.constant 0 : i32
    %c0_i32_2 = arith.constant 0 : i32
    return %c0_i32, %c0_i32_0, %c0_i32_1 : i32, i32, i32
  }
  func.func @transform_3(%arg0: i32, %arg1: i32) -> (i32, i32, i32) {
    %c0_i32 = arith.constant 0 : i32
    %c0_i32_0 = arith.constant 0 : i32
    return %arg0, %c0_i32, %arg1 : i32, i32, i32
  }
}

</mosaic_0001>

<bundles_post_ra>
// kernel: tpu_custom_call.1
= control target key start
LH: loop header
LB: loop body
LE: loop exit
PB: predicated region body
PF: predicated region fallthrough
CT: control target
= control target key end

     0   :  { %s503_s12 = smov 0   ;;  %s505_s13 = smov 0   ;;  %s592_s0 = inlined_call_operand.vmem [shape: f32[2,39,16], index: 0, kind: input, shape index: {}]   ;;  %s593_s1 = inlined_call_operand.vmem [shape: f32[1,39,1], index: 1, kind: input, shape index: {}]   ;;  %s594_s2 = inlined_call_operand.vmem [shape: f32[1,39,1], index: 2, kind: input, shape index: {}]   ;;  %s595_s3 = inlined_call_operand.vmem [shape: f32[2,39,16], index: 3, kind: output, shape index: {}]  }
   0x1   :  { %s507_s14 = smov 0  }
   0x2 LB: > { %s25_s15 = sadd.s32 1, %s476_s13  ;;  %p423_p0 = scmp.ge.s32.totalorder %s480_s14, 1  ;;  %s480_s14 = sphi %s507_s14, %s13_s14   ;;  %s476_s13 = sphi %s505_s13, %s597_s13   ;;  %s472_s12 = sphi %s503_s12, %s596_s12  }
   0x3   : > { %p27_p1 = scmp.ge.s32.totalorder %s25_s15, 2  ;;  %p156_p2 = scmp.lt.s32.totalorder %s480_s14, 3 }
   0x5   : > { %s599_s15 = smov (%p27_p1, %s25_s15), 0  ;;  %p157_p3 = pnand %p423_p0, %p156_p2 }
   0x6   : > { %v253_v0 = vld [vmem:[%s593_s1 + $0x10] sm:$0xff] (!%p157_p3)  ;;  %v251_v1 = vld [vmem:[%s593_s1] sm:$0xff] (!%p157_p3)  ;;  %v482_v2 = vmov (!%p157_p3), 0   ;;  %v254_v3 = vld [vmem:[%s593_s1 + $0x18] sm:$0xff] (!%p157_p3)  ;;  %p186_p4 = scmp.lt.s32.totalorder (!%p157_p3), %s472_s12, 1  ;;  %vm207_vm0 = vcmask (!%p157_p3), 130048  }
   0x7   : > { %160 = sbr.rel (%p157_p3) target bundleno = 156 (0x9c), region = 32  ;;  %455 = vset.pattern.permute.xlu1 (!%p157_p3), %v482_v2  ;;  %454 = vset.pattern.permute.xlu0 (!%p157_p3), %v482_v2  ;;  %v252_v4 = vld [vmem:[%s593_s1 + $0x8] sm:$0xff] (!%p157_p3)  ;;  %v256_v5 = vld [vmem:[%s594_s2] sm:$0xff] (!%p157_p3)  ;;  %v258_v7 = vld [vmem:[%s594_s2 + $0x10] sm:$0xff] (!%p157_p3)  ;;  %vm215_vm1 = vcmask (!%p157_p3), 129024  }
   0x8   : > { %283 = vperm.xlu1 (!%p157_p3), %455, %v253_v0   ;;  %273 = vperm.xlu0 (!%p157_p3), %454, %v251_v1   ;;  %v255_v6 = vld [vmem:[%s593_s1 + $0x20] sm:$0x7f] (!%p157_p3)  ;;  %v257_v8 = vld [vmem:[%s594_s2 + $0x8] sm:$0xff] (!%p157_p3)  ;;  %v259_v10 = vld [vmem:[%s594_s2 + $0x18] sm:$0xff] (!%p157_p3) }
   0x9   : > { %v260_v9 = vld [vmem:[%s594_s2 + $0x20] sm:$0x7f] (!%p157_p3) }
   0xc   : > { %288 = vperm.xlu1 (!%p157_p3), %455, %v254_v3   ;;  %278 = vperm.xlu0 (!%p157_p3), %454, %v252_v4  }
   0xe   : > { %s601_s12 = smov (!%p186_p4, %s472_s12), 1 }
   0xf   : > { %s428_s9 = smul.u32 40, %s601_s12 }
  0x10   : > { %303 = vperm.xlu1 %455, %v256_v5   ;;  %293 = vperm.xlu0 %454, %v255_v6  }
  0x11   : > { %s193_s16 = scalar_lea.vmem %s592_s0, %s428_s9  ;;  %s201_s19 = scalar_lea.vmem %s595_s3, %s428_s9 }
  0x12   : > { %v202_v11 = vld [vmem:[%s193_s16] sm:$0xff]  ;;  %v203_v12 = vld [vmem:[%s193_s16 + $0x8] sm:$0xff]  ;;  %v204_v17 = vld [vmem:[%s193_s16 + $0x10] sm:$0xff] }
  0x13   : > { %v208_v13 = vsel %vm207_vm0, %v202_v11, 0.0  ;;  %v209_v14 = vsel %vm207_vm0, %v203_v12, 0.0  ;;  %v224_v15 = vmul.f32 %v202_v11, %v202_v11  ;;  %v225_v16 = vmul.f32 %v203_v12, %v203_v12  ;;  %v205_v23 = vld [vmem:[%s193_s16 + $0x18] sm:$0xff]  ;;  %v206_v29 = vld [vmem:[%s193_s16 + $0x20] sm:$0x7f] }
  0x14   : > { %313 = vperm.xlu1 %455, %v258_v7   ;;  %308 = vperm.xlu0 %454, %v257_v8   ;;  %v210_v18 = vadd.f32 %v209_v14, %v208_v13  ;;  %v211_v19 = vsel %vm207_vm0, %v204_v17, 0.0  ;;  %v226_v20 = vmul.f32 %v204_v17, %v204_v17  ;;  %v213_v26 = vsel %vm207_vm0, %v205_v23, 0.0 }
  0x15   : > { %v229_v21 = vsel %vm207_vm0, %v224_v15, 0.0  ;;  %v230_v22 = vsel %vm207_vm0, %v225_v16, 0.0  ;;  %v227_v27 = vmul.f32 %v205_v23, %v205_v23  ;;  %v216_v32 = vsel %vm215_vm1, %v206_v29, 0.0 }
  0x16   : > { %v212_v24 = vadd.f32 %v211_v19, %v210_v18  ;;  %v231_v25 = vadd.f32 %v230_v22, %v229_v21  ;;  %v232_v28 = vsel %vm207_vm0, %v226_v20, 0.0  ;;  %v228_v33 = vmul.f32 %v206_v29, %v206_v29 }
  0x17   : > { %v234_v34 = vsel %vm207_vm0, %v227_v27, 0.0 }
  0x18   : > { %323 = vperm.xlu1 %455, %v260_v9   ;;  %318 = vperm.xlu0 %454, %v259_v10   ;;  %v214_v30 = vadd.f32 %v213_v26, %v212_v24  ;;  %v233_v31 = vadd.f32 %v232_v28, %v231_v25  ;;  %v236_v37 = vsel %vm215_vm1, %v228_v33, 0.0 }
  0x1a   : > { %v217_v35 = vadd.f32 %v216_v32, %v214_v30  ;;  %v235_v36 = vadd.f32 %v234_v34, %v233_v31 }
  0x1c   : > { %v218_v38 = vrot.slane %v217_v35, 4  ;;  %v237_v39 = vadd.f32 %v236_v37, %v235_v36 }
  0x1e   : > { %v219_v40 = vadd.f32 %v218_v38, %v217_v35  ;;  %v238_v41 = vrot.slane %v237_v39, 4 }
  0x20   : > { %v220_v42 = vrot.slane %v219_v40, 2  ;;  %v239_v43 = vadd.f32 %v238_v41, %v237_v39 }
  0x22   : > { %v221_v44 = vadd.f32 %v220_v42, %v219_v40  ;;  %v240_v45 = vrot.slane %v239_v43, 2 }
  0x24   : > { %v222_v46 = vrot.slane %v221_v44, 1  ;;  %v241_v47 = vadd.f32 %v240_v45, %v239_v43 }
  0x26   : > { %v223_v48 = vadd.f32 %v222_v46, %v221_v44  ;;  %v242_v49 = vrot.slane %v241_v47, 1 }
  0x28   : > { %v243_v50 = vadd.f32 %v242_v49, %v241_v47  ;;  %v244_v51 = vmul.f32 0.025641026, %v223_v48 }
  0x2a   : > { %v245_v52 = vmul.f32 0.025641026, %v243_v50  ;;  %v246_v53 = vmul.f32 %v244_v51, %v244_v51  ;;  %v261_v57 = vsub.f32 %v202_v11, %v244_v51  ;;  %v263_v61 = vsub.f32 %v204_v17, %v244_v51 }
  0x2b   : > { %v262_v63 = vsub.f32 %v203_v12, %v244_v51  ;;  %v264_v2 = vsub.f32 %v205_v23, %v244_v51  ;;  %v265_v6 = vsub.f32 %v206_v29, %v244_v51 }
  0x2c   : > { %v247_v54 = vsub.f32 %v245_v52, %v246_v53 }
  0x2e   : > { %v248_v55 = vmax.f32 %v247_v54, 0.0 }
  0x30   : > { %v249_v56 = vadd.f32 1e-06, %v248_v55 }
  0x32   : > { %456 = vrsqrt.f32 %v249_v56 }
  0x3c   : > { %v457_v58 = vpop.eup %456 }
  0x3d   : > { %v266_v62 = vmul.f32 %v457_v58, %v261_v57  ;;  %v268_v3 = vmul.f32 %v457_v58, %v263_v61  ;;  %v267_v5 = vmul.f32 %v457_v58, %v262_v63  ;;  %v269_v11 = vmul.f32 %v457_v58, %v264_v2 }
  0x3e   : > { %v270_v12 = vmul.f32 %v457_v58, %v265_v6 }
  0x87   : > { %v284_v59 = vpop.permute.xlu1 %283  ;;  %v274_v60 = vpop.permute.xlu0 %273 }
  0x88   : > { %v296_v4 = vmul.f32 %v274_v60, %v266_v62  ;;  %v298_v10 = vmul.f32 %v284_v59, %v268_v3 }
  0x8b   : > { %v289_v0 = vpop.permute.xlu1 %288  ;;  %v279_v1 = vpop.permute.xlu0 %278 }
  0x8c   : > { %v297_v13 = vmul.f32 %v279_v1, %v267_v5  ;;  %v299_v18 = vmul.f32 %v289_v0, %v269_v11 }
  0x8f   : > { %v304_v7 = vpop.permute.xlu1 %303  ;;  %v294_v8 = vpop.permute.xlu0 %293 }
  0x90   : > { %v326_v9 = vadd.f32 %v304_v7, %v296_v4  ;;  %v300_v19 = vmul.f32 %v294_v8, %v270_v12 }
  0x92   : > { %331 = vst.msk [vmem:[%s201_s19] sm:$0xff] %vm207_vm0, %v326_v9 }
  0x93   : > { %v314_v14 = vpop.permute.xlu1 %313  ;;  %v309_v15 = vpop.permute.xlu0 %308 }
  0x94   : > { %v328_v16 = vadd.f32 %v314_v14, %v298_v10  ;;  %v327_v17 = vadd.f32 %v309_v15, %v297_v13 }
  0x96   : > { %333 = vst.msk [vmem:[%s201_s19 + $0x10] sm:$0xff] %vm207_vm0, %v328_v16  ;;  %332 = vst.msk [vmem:[%s201_s19 + $0x8] sm:$0xff] %vm207_vm0, %v327_v17 }
  0x97   : > { %v324_v20 = vpop.permute.xlu1 %323  ;;  %v319_v21 = vpop.permute.xlu0 %318 }
  0x98   : > { %v330_v22 = vadd.f32 %v324_v20, %v300_v19  ;;  %v329_v23 = vadd.f32 %v319_v21, %v299_v18 }
  0x9a   : > { %335 = vst.msk [vmem:[%s201_s19 + $0x20] sm:$0x7f] %vm215_vm1, %v330_v22 }
  0x9b   : > { %334 = vst.msk [vmem:[%s201_s19 + $0x18] sm:$0xff] %vm207_vm0, %v329_v23 }
  0x9c PF: > { %s13_s14 = sadd.s32 1, %s480_s14   ;;  %s596_s12 = smov %s476_s13 }
  0x9d   : > { %p10_p5 = scmp.ge.s32.totalorder %s13_s14, 4   ;;  %s597_s13 = smov %s599_s15 }
  0x9f   :  { %12 = sbr.rel (!%p10_p5) target bundleno = 2 (0x2), region = 62 }

</bundles_post_ra>
